<compile_context>
chip_gen: v7x
topology: tpu7x:2x2x1
jax: 0.10.0
libtpu: 0.0.40
codegen_flags: <defaults>
</compile_context>

<pallas_src>
import functools

import jax
import jax.numpy as jnp
import numpy as np
from jax.experimental import pallas as pl
from jax.experimental.pallas import tpu as pltpu


# ----------------------------------------------------------------------------
# Sizing helpers
# ----------------------------------------------------------------------------
@functools.lru_cache(maxsize=None)
def _vmem_limit_bytes():
    """Generation-aware scoped-VMEM request: ~96 MiB on 128 MiB parts (v5e/v6e),
    ~48 MiB on v7x (64 MiB physical); conservative 48 MiB if the query fails."""
    mib = 1024 * 1024
    try:
        cap = int(pltpu.get_tpu_info().vmem_capacity_bytes)
    except Exception:
        return 48 * mib
    return int(max(32 * mib, min(cap * 3 // 4, 96 * mib)))


def _divisor_tile(n, candidates):
    """Largest candidate that evenly divides n, else the full extent."""
    for c in candidates:
        if n >= c and n % c == 0:
            return c
    return n


def _n_tile(g, bytes_per_col, budget, candidates=(1024, 512, 256, 128)):
    for c in candidates:
        if g % c == 0 and 2 * c * bytes_per_col <= budget:
            return c
    return g


def _m_tiling(m, bytes_per_row, budget):
    """Pick an M tile (pref. a big exact divisor); else pad M up to a multiple."""
    cands = [c for c in (1024, 512, 256, 128, 64, 32, 16, 8)
             if 2 * c * bytes_per_row <= budget] or [8]
    for c in cands:
        if m >= c and m % c == 0:
            return c, m
    tm = 8
    for c in cands:                       # descending: biggest tile <= M
        if c <= max(m, 8):
            tm = c
            break
    m_pad = ((max(m, tm) + tm - 1) // tm) * tm
    return tm, m_pad


# ----------------------------------------------------------------------------
# Kernel 1: hoisted LSTM input projection  (T*B, H) @ (H, 4H) + bias
#   - M tiled ("parallel"), 4H axis tiled ("parallel") so the resident weight
#     block is only (H, tn); bias fused; bf16 operands, f32 accumulate.
# ----------------------------------------------------------------------------
def _matmul_bias_kernel(x_ref, w_ref, b_ref, o_ref):
    acc = jnp.dot(x_ref[...], w_ref[...], preferred_element_type=jnp.float32)
    o_ref[...] = (acc + b_ref[...]).astype(o_ref.dtype)


def input_projection(x_tm, wih_t, bias_row, matmul_dtype):
    """x_tm: (T, B, H) time-major. Returns x @ W_ih^T + b as (T, B, 4H)."""
    T, B, H = x_tm.shape
    G = wih_t.shape[1]                       # 4H
    M = T * B
    ib = np.dtype(matmul_dtype).itemsize
    limit = _vmem_limit_bytes()

    x_flat = x_tm.reshape(M, H).astype(matmul_dtype)
    w = wih_t.astype(matmul_dtype)
    bias = bias_row.astype(jnp.float32)

    tn = _n_tile(G, bytes_per_col=H * ib, budget=limit // 4)
    tm, m_pad = _m_tiling(M, bytes_per_row=(H + tn) * ib, budget=limit // 3)
    if m_pad != M:                            # pad-and-slice guard
        x_flat = jnp.pad(x_flat, ((0, m_pad - M), (0, 0)))

    cost = pl.CostEstimate(
        flops=int(2 * m_pad * H * G),
        transcendentals=0,
        bytes_accessed=int(m_pad * H * ib + H * G * ib + m_pad * G * ib + G * 4))

    out = pl.pallas_call(
        _matmul_bias_kernel,
        grid=(m_pad // tm, G // tn),
        in_specs=[
            pl.BlockSpec((tm, H), lambda m, n: (m, 0)),   # invariant along n
            pl.BlockSpec((H, tn), lambda m, n: (0, n)),   # N-tiled weight
            pl.BlockSpec((1, tn), lambda m, n: (0, n)),   # fused bias row
        ],
        out_specs=pl.BlockSpec((tm, tn), lambda m, n: (m, n)),
        out_shape=jax.ShapeDtypeStruct((m_pad, G), matmul_dtype),
        compiler_params=pltpu.CompilerParams(
            dimension_semantics=("parallel", "parallel"),
            vmem_limit_bytes=limit),
        cost_estimate=cost,
    )(x_flat, w, bias)
    return out[:M].reshape(T, B, G)


# ----------------------------------------------------------------------------
# Kernel 2: LSTM recurrence (time-major).  Grid = (batch-blocks "parallel",
# time-chunks "arbitrary"); h/c carried in VMEM scratch; one bf16 h @ W_hh^T
# MXU push per timestep; dense per-step reads/writes; fori_loop(unroll=True).
# ----------------------------------------------------------------------------
def _lstm_recurrence_kernel(xp_ref, whh_ref, out_ref, h_sc, c_sc, *, H, TT):
    @pl.when(pl.program_id(1) == 0)
    def _():
        h_sc[...] = jnp.zeros_like(h_sc)
        c_sc[...] = jnp.zeros_like(c_sc)

    whh = whh_ref[...]                                  # (H, 4H), stays resident

    def step(s, carry):
        xp = xp_ref[s].astype(jnp.float32)              # (tb, 4H) dense tile
        h_prev = h_sc[...]
        gates = xp + jnp.dot(h_prev.astype(whh.dtype), whh,
                             preferred_element_type=jnp.float32)
        # PyTorch gate order [i, f, g, o].
        # TODO(synk): for production configs keep H a multiple of 128 so these
        # gate slabs stay lane-aligned (free vreg selects instead of XLU work).
        i_g = jax.nn.sigmoid(gates[:, 0 * H:1 * H])
        f_g = jax.nn.sigmoid(gates[:, 1 * H:2 * H])
        g_g = jnp.tanh(gates[:, 2 * H:3 * H])
        o_g = jax.nn.sigmoid(gates[:, 3 * H:4 * H])
        c_new = f_g * c_sc[...] + i_g * g_g
        h_new = o_g * jnp.tanh(c_new)
        c_sc[...] = c_new
        h_sc[...] = h_new
        out_ref[s] = h_new.astype(out_ref.dtype)        # dense per-step store
        return carry

    jax.lax.fori_loop(0, TT, step, 0, unroll=True)


def lstm_recurrence(x_proj, whh_t, matmul_dtype):
    """x_proj: (T, B, 4H) time-major. Returns hidden sequence (T, B, H)."""
    T, B, G = x_proj.shape
    H = whh_t.shape[0]
    ib = np.dtype(matmul_dtype).itemsize
    limit = _vmem_limit_bytes()
    whh = whh_t.astype(matmul_dtype)

    # Split the batch across v7x's two TensorCores only when each half still
    # feeds the 256-row MXU reasonably; single block otherwise (v5e/v6e).
    tb = B // 2 if (B % 2 == 0 and B >= 256) else B

    tt_cands = tuple(c for c in (32, 16, 8, 4, 2, 1)
                     if 2 * c * tb * G * ib <= limit // 4) or (1,)
    TT = _divisor_tile(T, tt_cands)

    out = pl.pallas_call(
        functools.partial(_lstm_recurrence_kernel, H=H, TT=TT),
        grid=(B // tb, T // TT),
        in_specs=[
            pl.BlockSpec((TT, tb, G), lambda bi, ti: (ti, bi, 0)),
            # Grid-invariant weight: fetched once (index never changes).
            pl.BlockSpec((H, G), lambda bi, ti: (0, 0)),
        ],
        out_specs=pl.BlockSpec((TT, tb, H), lambda bi, ti: (ti, bi, 0)),
        out_shape=jax.ShapeDtypeStruct((T, B, H), matmul_dtype),
        scratch_shapes=[
            pltpu.VMEM((tb, H), jnp.float32),   # h carry (persists across time)
            pltpu.VMEM((tb, H), jnp.float32),   # c carry
        ],
        compiler_params=pltpu.CompilerParams(
            dimension_semantics=("parallel", "arbitrary"),  # time is serial
            vmem_limit_bytes=limit),
    )(x_proj, whh)
    return out


# ----------------------------------------------------------------------------
# Kernel 3: GatedCNN  out = conv_a(h) * sigmoid(conv_b(h)), Conv1d no bias,
# "same" padding.  No im2col in HBM: each (batch, time-chunk) halo window is
# manually DMA'd (double-buffered) from the padded time-major activations and
# the K taps are accumulated against a fused (K*H, 2H) weight in VMEM.
# ----------------------------------------------------------------------------
def _gated_conv_kernel(hpad_ref, w_ref, o_ref, buf, sem, acc_ref, *, H, K, tt):
    b = pl.program_id(0)
    ti = pl.program_id(1)
    n_t = pl.num_programs(1)
    rows = tt + K - 1

    def window_copy(t_block, slot):
        src = hpad_ref.at[pl.ds(t_block * tt, rows), pl.ds(b, 1), :]
        return pltpu.make_async_copy(src, buf.at[slot], sem.at[slot])

    slot = jax.lax.rem(ti, 2)

    @pl.when(ti == 0)
    def _():                            # prime the first window of this batch
        window_copy(0, 0).start()

    window_copy(ti, slot).wait()        # current halo window is now in VMEM

    @pl.when(ti + 1 < n_t)
    def _():                            # prefetch next window into the other slot
        window_copy(ti + 1, 1 - slot).start()

    win = buf.at[slot]                  # (rows, 1, H) view
    for dk in range(K):                 # K is small and static
        xk = win[pl.ds(dk, tt), 0, :]                # (tt, H) shifted tap
        wk = w_ref[pl.ds(dk * H, H), :]              # (H, 2H) fused a|b weights
        contrib = jnp.dot(xk, wk, preferred_element_type=jnp.float32)
        if dk == 0:
            acc_ref[...] = contrib
        else:
            acc_ref[...] += contrib
    a = acc_ref[:, :H]
    g = acc_ref[:, H:]
    o_ref[...] = (a * jax.nn.sigmoid(g)).astype(o_ref.dtype)


def gated_conv(h_tm, wa, wb, kernel_size, matmul_dtype):
    """h_tm: (T, B, H) time-major; wa, wb: (K, H_in, H_out). Returns (B, T, H)."""
    T, B, H = h_tm.shape
    K = kernel_size
    # Symmetric "same" padding matches PyTorch padding=(k-1)//2 only for odd k.
    assert K % 2 == 1, "even kernel_size changes the output length in PyTorch"
    pad = (K - 1) // 2
    ib = np.dtype(matmul_dtype).itemsize
    limit = _vmem_limit_bytes()

    hpad = jnp.pad(h_tm, ((pad, pad), (0, 0), (0, 0)))            # (T+2p, B, H)
    # Fuse conv_a / conv_b weights -> one (K*H, 2H) matrix.
    w_ab = jnp.concatenate(
        [wa.reshape(K * H, H), wb.reshape(K * H, H)], axis=1).astype(matmul_dtype)

    hl = max(H, 128)                         # lane-padded width for budgeting
    w_bytes = 2 * K * H * 2 * H * ib

    def fits(c):
        buf_bytes = 2 * (c + K - 1) * 8 * hl * ib   # (rows,1,H) sublane padding
        out_bytes = 2 * c * hl * 4
        acc_bytes = c * 2 * hl * 4
        return w_bytes + buf_bytes + out_bytes + acc_bytes <= limit * 3 // 4

    tt_cands = tuple(c for c in (256, 128, 64, 32, 16, 8) if fits(c)) or (8,)
    tt = _divisor_tile(T, tt_cands)
    n_t = T // tt
    rows = tt + K - 1

    cost = pl.CostEstimate(
        flops=int(2 * B * T * K * H * 2 * H),
        transcendentals=int(B * T * H),
        bytes_accessed=int(hpad.size * ib + w_ab.size * ib + B * T * H * 4))

    out = pl.pallas_call(
        functools.partial(_gated_conv_kernel, H=H, K=K, tt=tt),
        grid=(B, n_t),
        in_specs=[
            pl.BlockSpec(memory_space=pl.ANY),                   # halo-DMA'd
            pl.BlockSpec((K * H, 2 * H), lambda b, ti: (0, 0)),  # fused weights
        ],
        out_specs=pl.BlockSpec((None, tt, H), lambda b, ti: (b, ti, 0)),
        out_shape=jax.ShapeDtypeStruct((B, T, H), jnp.float32),
        scratch_shapes=[
            pltpu.VMEM((2, rows, 1, H), matmul_dtype),  # double-buffered windows
            pltpu.SemaphoreType.DMA((2,)),
            pltpu.VMEM((tt, 2 * H), jnp.float32),       # a/b tap accumulator
        ],
        compiler_params=pltpu.CompilerParams(
            dimension_semantics=("parallel", "arbitrary"),
            vmem_limit_bytes=limit),
        cost_estimate=cost,
    )(hpad, w_ab)
    return out


# ----------------------------------------------------------------------------
# Full RCNN forward (LSTM then GatedCNN), plus a pure-JAX reference.
# ----------------------------------------------------------------------------
def rcnn_forward(x, params, matmul_dtype=jnp.bfloat16):
    """x: (B, T, H) batch-first, like the PyTorch module. Returns (B, T, H)."""
    # One activation transpose up front keeps everything downstream time-major
    # so the serial recurrence works on dense per-step tiles.
    x_tm = jnp.transpose(x, (1, 0, 2))                               # (T, B, H)
    xp = input_projection(x_tm, params['wih_t'], params['bias'], matmul_dtype)
    h_tm = lstm_recurrence(xp, params['whh_t'], matmul_dtype)        # (T, B, H)
    return gated_conv(h_tm, params['wa'], params['wb'], params['k'],
                      matmul_dtype)                                  # (B, T, H)


def rcnn_reference(x, params):
    B, T, H = x.shape
    wih_t, whh_t, bias = params['wih_t'], params['whh_t'], params['bias']

    def step(carry, xt):
        h, c = carry
        gates = xt @ wih_t + h @ whh_t + bias
        i = jax.nn.sigmoid(gates[:, 0 * H:1 * H])
        f = jax.nn.sigmoid(gates[:, 1 * H:2 * H])
        g = jnp.tanh(gates[:, 2 * H:3 * H])
        o = jax.nn.sigmoid(gates[:, 3 * H:4 * H])
        c = f * c + i * g
        h = o * jnp.tanh(c)
        return (h, c), h

    init = (jnp.zeros((B, H), jnp.float32), jnp.zeros((B, H), jnp.float32))
    _, hs = jax.lax.scan(step, init, jnp.transpose(x, (1, 0, 2)))
    h = jnp.transpose(hs, (1, 0, 2))

    k, pad = params['k'], (params['k'] - 1) // 2
    hp = jnp.pad(h, ((0, 0), (pad, pad), (0, 0)))
    a = jnp.zeros_like(h)
    b = jnp.zeros_like(h)
    for dk in range(k):
        xs = hp[:, dk:dk + T, :]
        a = a + jnp.einsum('bth,hg->btg', xs, params['wa'][dk])
        b = b + jnp.einsum('bth,hg->btg', xs, params['wb'][dk])
    return a * jax.nn.sigmoid(b)


def make_params(key, hidden_size, kernel_size):
    H, k = hidden_size, kernel_size
    ks = jax.random.split(key, 6)
    scale = 1.0 / np.sqrt(H)
    # LSTM: PyTorch stores W_ih (4H, H), W_hh (4H, H), b_ih/b_hh (4H,).
    w_ih = jax.random.uniform(ks[0], (4 * H, H), jnp.float32, -scale, scale)
    w_hh = jax.random.uniform(ks[1], (4 * H, H), jnp.float32, -scale, scale)
    b_ih = jax.random.uniform(ks[2], (4 * H,), jnp.float32, -scale, scale)
    b_hh = jax.random.uniform(ks[3], (4 * H,), jnp.float32, -scale, scale)
    # Conv1d weights: PyTorch layout (H_out, H_in, k) -> ours (k, H_in, H_out).
    cscale = 1.0 / np.sqrt(H * k)
    w_cnn = jax.random.uniform(ks[4], (H, H, k), jnp.float32, -cscale, cscale)
    w_gate = jax.random.uniform(ks[5], (H, H, k), jnp.float32, -cscale, cscale)
    return {
        'wih_t': w_ih.T,                              # (H, 4H)
        'whh_t': w_hh.T,                              # (H, 4H)
        'bias': (b_ih + b_hh).reshape(1, 4 * H),      # (1, 4H)
        'wa': jnp.transpose(w_cnn, (2, 1, 0)),        # (k, H_in, H_out)
        'wb': jnp.transpose(w_gate, (2, 1, 0)),       # (k, H_in, H_out)
        'k': k,
    }


if __name__ == "__main__":
    B, T, H, K = 2, 8, 32, 3
    key = jax.random.PRNGKey(0)
    k_x, k_p = jax.random.split(key)
    x = jax.random.normal(k_x, (B, T, H), jnp.float32)
    params = make_params(k_p, H, K)

    ref = jax.block_until_ready(rcnn_reference(x, params))

    # f32 MXU path: exact-semantics check against the pure-JAX reference.
    out_f32 = jax.block_until_ready(
        rcnn_forward(x, params, matmul_dtype=jnp.float32))
    assert out_f32.shape == (B, T, H)
    assert np.allclose(np.asarray(out_f32), np.asarray(ref), atol=1e-4, rtol=1e-4)

    # bf16 MXU path (performance default): relaxed tolerance as expected.
    out_bf16 = jax.block_until_ready(rcnn_forward(x, params))
    assert out_bf16.shape == (B, T, H)
    assert np.allclose(np.asarray(out_bf16), np.asarray(ref), atol=5e-2, rtol=5e-2)

    print("KERNEL_OK")
</pallas_src>

<mosaic_0001>
module attributes {stable_mosaic.version = 11 : i64} {
  func.func @_matmul_bias_kernel(%arg0: i32, %arg1: i32, %arg2: memref<16x32xf32, #tpu.memory_space<vmem>>, %arg3: memref<32x128xf32, #tpu.memory_space<vmem>>, %arg4: memref<1x128xf32, #tpu.memory_space<vmem>>, %arg5: memref<16x128xf32, #tpu.memory_space<vmem>>) attributes {dimension_semantics = [#tpu.dimension_semantics<parallel>, #tpu.dimension_semantics<parallel>], iteration_bounds = array<i64: 1, 1>, scalar_prefetch = 0 : i64, scratch_operands = 0 : i64, tpu.core_type = #tpu.core_type<tc>, window_params = [{transform_indices = @transform_0, window_bounds = array<i64: 16, 32>}, {transform_indices = @transform_1, window_bounds = array<i64: 32, 128>}, {transform_indices = @transform_2, window_bounds = array<i64: 1, 128>}, {transform_indices = @transform_3, window_bounds = array<i64: 16, 128>}]} {
    %c0 = arith.constant 0 : index
    %c0_0 = arith.constant 0 : index
    %0 = vector.load %arg2[%c0, %c0_0] : memref<16x32xf32, #tpu.memory_space<vmem>>, vector<16x32xf32>
    %c0_1 = arith.constant 0 : index
    %c0_2 = arith.constant 0 : index
    %1 = vector.load %arg3[%c0_1, %c0_2] : memref<32x128xf32, #tpu.memory_space<vmem>>, vector<32x128xf32>
    %cst = arith.constant dense<0.000000e+00> : vector<16x128xf32>
    %2 = tpu.matmul %0, %1, %cst {dimension_numbers = #tpu.dot_dimension_numbers<[1], [0], [0], [1], [0, 0, 1, 1], [], []>} : vector<16x32xf32>, vector<32x128xf32>, vector<16x128xf32> -> vector<16x128xf32>
    %c0_3 = arith.constant 0 : index
    %c0_4 = arith.constant 0 : index
    %3 = vector.load %arg4[%c0_3, %c0_4] : memref<1x128xf32, #tpu.memory_space<vmem>>, vector<1x128xf32>
    %4 = vector.broadcast %3 : vector<1x128xf32> to vector<16x128xf32>
    %5 = arith.addf %2, %4 : vector<16x128xf32>
    %c0_5 = arith.constant 0 : index
    %c0_6 = arith.constant 0 : index
    %6 = vector.load %arg5[%c0_5, %c0_6] : memref<16x128xf32, #tpu.memory_space<vmem>>, vector<16x128xf32>
    tpu.vector_store %arg5[%c0_5, %c0_6], %5 {strides = array<i32>} : memref<16x128xf32, #tpu.memory_space<vmem>>, vector<16x128xf32>,
    return
  }
  func.func @transform_0(%arg0: i32, %arg1: i32) -> (i32, i32) {
    %c0_i32 = arith.constant 0 : i32
    %c0_i32_0 = arith.constant 0 : i32
    return %arg0, %c0_i32 : i32, i32
  }
  func.func @transform_1(%arg0: i32, %arg1: i32) -> (i32, i32) {
    %c0_i32 = arith.constant 0 : i32
    %c0_i32_0 = arith.constant 0 : i32
    return %c0_i32, %arg1 : i32, i32
  }
  func.func @transform_2(%arg0: i32, %arg1: i32) -> (i32, i32) {
    %c0_i32 = arith.constant 0 : i32
    %c0_i32_0 = arith.constant 0 : i32
    return %c0_i32, %arg1 : i32, i32
  }
  func.func @transform_3(%arg0: i32, %arg1: i32) -> (i32, i32) {
    %c0_i32 = arith.constant 0 : i32
    return %arg0, %arg1 : i32, i32
  }
}

</mosaic_0001>

<bundles_post_ra>
// kernel: tpu_custom_call.1
= control target key start
LH: loop header
LB: loop body
LE: loop exit
PB: predicated region body
PF: predicated region fallthrough
CT: control target
= control target key end

     0   :  { %8 = vsyncpa [#allocation3], 0  ;;  %s336_s0 = inlined_call_operand.hbm [shape: f32[16,32], index: 0, kind: input, shape index: {}]   ;;  %s337_s1 = inlined_call_operand.hbm [shape: f32[32,128], index: 1, kind: input, shape index: {}]   ;;  %s338_s2 = inlined_call_operand.vmem [shape: f32[1,128], index: 2, kind: input, shape index: {}]   ;;  %s339_s3 = inlined_call_operand.hbm [shape: f32[16,128], index: 3, kind: output, shape index: {}]  }
   0x1   :  { %9 = vsyncpa [#allocation6], 0 }
   0x2   :  { %10 = vsyncpa [#allocation4], 0  ;;  %s263_s12 = smov [#allocation2]   ;;  %s191_s16 = scalar_lea.hbm %s336_s0, 256 }
   0x3   :  { %s16_s13 = sshll.u32 %s263_s12, 4  ;;  %p192_p0 = scmp.ne.s32.totalorder %s336_s0, %s191_s16  ;;  %s17_s13 = int_to_ptr.vmem [resolvable:$true] %s16_s13 }
   0x4   :  { %p195_p1 = scmp.lt.u32.totalorder %s191_s16, %s336_s0 }
   0x6   :  { %p197_p2 = pnand %p195_p1, %p192_p0 }
   0x8   :  { %200 = shalt.err (!%p197_p2)
}
   0x9   :  { %s201_s21 = scalar_lea.vmem %s17_s13, 256  ;;  %p206_p4 = scmp.lt.s32.totalorder %s17_s13, %s17_s13 }
   0xa   :  { %p202_p3 = scmp.ne.s32.totalorder %s17_s13, %s201_s21  ;;  %p207_p5 = scmp.lt.s32.totalorder %s201_s21, %s201_s21 }
   0xc   :  { %p208_p6 = por %p207_p5, %p206_p4 }
   0xe   :  { %p209_p7 = pnand %p208_p6, %p202_p3 }
  0x10   :  { %212 = shalt.err (!%p209_p7)
}
  0x11   :  { %s264_s22 = smov 128   ;;  %s265_s23 = smov 8  }
  0x12   :  { %22 = dma.hbm_to_vmem [thread:$0]  %s336_s0, 256, %s17_s13, [#allocation3], %s264_s22, %s264_s22, %s265_s23  }
  0x13   :  { %s266_s26 = smov [#allocation5]   ;;  %s213_s30 = scalar_lea.hbm %s337_s1, 512 }
  0x14   :  { %s28_s27 = sshll.u32 %s266_s26, 4  ;;  %p214_p8 = scmp.ne.s32.totalorder %s337_s1, %s213_s30  ;;  %s29_s27 = int_to_ptr.vmem [resolvable:$true] %s28_s27 }
  0x15   :  { %p217_p9 = scmp.lt.u32.totalorder %s213_s30, %s337_s1 }
  0x17   :  { %p219_p10 = pnand %p217_p9, %p214_p8 }
  0x19   :  { %222 = shalt.err (!%p219_p10)
}
  0x1a   :  { %s223_s8 = scalar_lea.vmem %s29_s27, 512  ;;  %p228_p12 = scmp.lt.s32.totalorder %s29_s27, %s29_s27 }
  0x1b   :  { %p224_p11 = scmp.ne.s32.totalorder %s29_s27, %s223_s8  ;;  %p229_p13 = scmp.lt.s32.totalorder %s223_s8, %s223_s8 }
  0x1d   :  { %p230_p0 = por %p229_p13, %p228_p12 }
  0x1f   :  { %p231_p1 = pnand %p230_p0, %p224_p11 }
  0x21   :  { %234 = shalt.err (!%p231_p1)
}
  0x22   :  { %34 = dma.hbm_to_vmem [thread:$0]  %s337_s1, 512, %s29_s27, [#allocation6], %s264_s22, %s264_s22, %s265_s23  }
  0x23   :  { %257 = dma.done.wait [#allocation3], 256  }
  0x24   :  { %258 = vsyncadd [#allocation3], 4294967040 }
  0x25   :  { %259 = dma.done.wait [#allocation6], 512  }
  0x26   :  { %260 = vsyncadd [#allocation6], 4294966784  ;;  %vm56_vm0 = vcmask 261120   ;;  %v45_v0 = vld [vmem:[#allocation5] sm:$0xff]  ;;  %v46_v1 = vld [vmem:[#allocation5 + $0x8] sm:$0xff]  ;;  %s267_s11 = smov [#allocation7]  }
  0x27   :  { %v47_v2 = vld [vmem:[#allocation5 + $0x10] sm:$0xff]  ;;  %v178_v3 = vpack.c.bf16 %v46_v1, %v45_v0  ;;  %v48_v4 = vld [vmem:[#allocation5 + $0x18] sm:$0xff]  ;;  %s145_s12 = sshll.u32 %s267_s11, 4  ;;  %s146_s12 = int_to_ptr.vmem [resolvable:$true] %s145_s12 }
  0x28   :  { %v43_v5 = vld [vmem:[#allocation2] sm:$0xff]  ;;  %v182_v6 = vpack.c.bf16 %v48_v4, %v47_v2  ;;  %v44_v7 = vld [vmem:[#allocation2 + $0x8] sm:$0xff]  ;;  %s235_s13 = scalar_lea.vmem %s146_s12, 256  ;;  %p240_p3 = scmp.lt.s32.totalorder %s146_s12, %s146_s12 }
  0x29   :  { %175 = vmatprep.mubr.msk.f32.mxu0 %vm56_vm0, %v43_v5  ;;  %179 = vmatprep.subr.bf16.mxu0 %v178_v3  ;;  %v158_v8 = vld [vmem:[%s338_s2] ss:$0 sm:$0xff]  ;;  %p236_p2 = scmp.ne.s32.totalorder %s146_s12, %s235_s13  ;;  %p241_p4 = scmp.lt.s32.totalorder %s235_s13, %s235_s13 }
  0x2a   :  { %181 = vmatpush3.bf16.msra.mxu0 %v178_v3 }
  0x2b   :  { %183 = vmatprep.subr.bf16.mxu0 %v182_v6  ;;  %p242_p5 = por %p241_p4, %p240_p3 }
  0x2d   :  { %p243_p6 = pnand %p242_p5, %p236_p2 }
  0x2e   :  { %185 = vmatpush3.bf16.msra.mxu0 %v182_v6 }
  0x31   :  { %176 = vmatmul.mubr.msk.f32.vlgmr.msra.gmra.mrb[0].mxu0 %vm56_vm0, %v44_v7 }
 0x104   :  { %v177_v9 = vpop.f32.mrb[0].mxu0 }
 0x105   :  { %v135_v10 = vadd.f32 %v177_v9, %v158_v8  ;;  %v129_v11 = vpop.f32.mrb[1].mxu0 }
 0x106   :  { %v130_v12 = vadd.f32 %v158_v8, %v129_v11 }
 0x107   :  { %139 = vst [vmem:[#allocation7 + $0x8] sm:$0xff] %v135_v10 }
 0x108   :  { %138 = vst [vmem:[#allocation7] sm:$0xff] %v130_v12 }
 0x109   :  { %246 = shalt.err (!%p243_p6)
}
 0x10a   :  { %s247_s2 = scalar_lea.hbm %s339_s3, 256 }
 0x10b   :  { %p248_p7 = scmp.ne.s32.totalorder %s339_s3, %s247_s2  ;;  %p251_p8 = scmp.lt.u32.totalorder %s247_s2, %s339_s3 }
 0x10d   :  { %p253_p9 = pnand %p251_p8, %p248_p7 }
 0x10f   :  { %256 = shalt.err (!%p253_p9)
}
 0x110   :  { %151 = dma.vmem_to_hbm [thread:$0]  %s146_s12, 256, %s339_s3, [#allocation4], %s264_s22, %s264_s22, %s265_s23  }
 0x111   :  { %261 = dma.done.wait [#allocation4], 256  }
 0x112   :  { %262 = vsyncadd [#allocation4], 4294967040 }
 0x113   :  { %155 = vsyncpa [#allocation3], 1 }
 0x114   :  { %156 = vsyncpa [#allocation6], 1 }
 0x115   :  { %157 = vsyncpa [#allocation4], 1 }

</bundles_post_ra>
